<compile_context>
chip_gen: v5e
topology: v5e:2x2
jax: 0.10.0
libtpu: 0.0.40
codegen_flags: <defaults>
</compile_context>

<pallas_src>
import functools

import jax
import jax.numpy as jnp
from jax import lax
from jax.experimental import pallas as pl
from jax.experimental.pallas import tpu as pltpu


def _mf_forward_kernel(u_ref, b_ref, pred_ref, loss_ref, *, TB, NB, D, B, L2):
    """One batch block of TB users.

    u_ref    : VMEM (TB, D)      f32   un-expanded user embeddings for this block
    b_ref    : VMEM (TB, NB*D)   f32   gathered bundle embeddings, lane-dense
    pred_ref : VMEM (TB, NB)     f32   inner-product scores
    loss_ref : VMEM (1, 1, 128)  f32   per-block partial L2 loss (broadcast scalar)
    """
    i = pl.program_id(0)

    u = u_ref[...]                                                  # (TB, D)

    # Mask padded batch rows (index >= B) out of the loss.  pred for padded rows is
    # computed but sliced off in the wrapper.
    rows = i * TB + lax.broadcasted_iota(jnp.int32, (TB, 1), 0)
    valid = (rows < B).astype(jnp.float32)                          # (TB, 1)

    u_sq = jnp.sum(u * u * valid)

    # NB-chunked compute: live set stays at (TB, D) per step instead of (TB, NB, D).
    pred_cols = []
    b_sq = jnp.float32(0.0)
    for j in range(NB):                                             # static, small trip count
        bj = b_ref[:, j * D:(j + 1) * D]                            # (TB, D) static slice
        pred_cols.append(jnp.sum(u * bj, axis=-1, keepdims=True))   # (TB, 1)
        b_sq = b_sq + jnp.sum(bj * bj * valid)

    # predict(): MF inner product, one dense (TB, NB) store.
    pred_ref[...] = jnp.concatenate(pred_cols, axis=-1)

    # regularize(): L2 on the *expanded* users (each user counted NB times) + gathered bundles.
    partial = L2 * (jnp.float32(NB) * u_sq + b_sq)
    loss_ref[...] = jnp.broadcast_to(partial, loss_ref.shape)


def _pick_tb(B, nb, D, budget_bytes=8 << 20):
    """Sublane-aligned batch tile that keeps the double-buffered block footprint small
    enough for every TPU generation's scoped-VMEM default (v7x included)."""
    tb = min(128, ((B + 7) // 8) * 8)
    per_row_bytes = (D + nb * D + nb) * 4
    while tb > 8 and 2 * tb * per_row_bytes > budget_bytes:
        tb = max(8, (tb // 2 // 8) * 8)
    return tb


def mf_forward(users_feature, bundles_feature, users, bundles, embed_l2_norm):
    """Forward pass of the MF base Model.

    users_feature:   (num_users, D)   f32
    bundles_feature: (num_bundles, D) f32
    users:   (B, 1)  int32 user indices
    bundles: (B, nb) int32 bundle indices
    Returns (pred (B, nb) f32, loss scalar f32).
    """
    B, nb = bundles.shape
    D = users_feature.shape[1]

    # propagate() == identity for the MF base.  Both gathers are cheap XLA gathers; the
    # gathered bundle rows are passed to the kernel lane-dense as (B, nb*D).
    users_emb = jnp.take(users_feature, users[:, 0], axis=0)                    # (B, D)
    bundles_emb = jnp.take(bundles_feature, bundles.reshape(-1), axis=0)        # (B*nb, D)
    bundles_emb = bundles_emb.reshape(B, nb * D)                                 # (B, nb*D)

    TB = _pick_tb(B, nb, D)
    num_blocks = pl.cdiv(B, TB)
    B_pad = num_blocks * TB
    pad_rows = B_pad - B

    users_emb = jnp.pad(users_emb.astype(jnp.float32), ((0, pad_rows), (0, 0)))
    bundles_emb = jnp.pad(bundles_emb.astype(jnp.float32), ((0, pad_rows), (0, 0)))

    kernel = functools.partial(
        _mf_forward_kernel, TB=TB, NB=nb, D=D, B=B, L2=float(embed_l2_norm))

    grid_spec = pltpu.PrefetchScalarGridSpec(
        num_scalar_prefetch=0,
        grid=(num_blocks,),
        in_specs=[
            pl.BlockSpec((TB, D), lambda i: (i, 0)),          # users block
            pl.BlockSpec((TB, nb * D), lambda i: (i, 0)),     # gathered bundles block (lane-dense)
        ],
        out_specs=[
            pl.BlockSpec((TB, nb), lambda i: (i, 0)),         # pred
            pl.BlockSpec((1, 1, 128), lambda i: (i, 0, 0)),   # per-block partial loss
        ],
    )

    cost = pl.CostEstimate(
        flops=int(4 * B_pad * nb * D + 3 * B_pad * D),
        transcendentals=0,
        bytes_accessed=int(4 * (B_pad * D              # users read
                                + B_pad * nb * D       # gathered bundle rows read
                                + B_pad * nb           # pred write
                                + num_blocks * 128)),  # loss partials write
    )

    pred_pad, loss_parts = pl.pallas_call(
        kernel,
        out_shape=(
            jax.ShapeDtypeStruct((B_pad, nb), jnp.float32),
            jax.ShapeDtypeStruct((num_blocks, 1, 128), jnp.float32),
        ),
        grid_spec=grid_spec,
        compiler_params=pltpu.CompilerParams(
            dimension_semantics=("parallel",),         # batch blocks are fully independent
        ),
        cost_estimate=cost,
    )(users_emb, bundles_emb)

    pred = pred_pad[:B]
    loss = jnp.sum(loss_parts[:, 0, 0])
    return pred, loss


def xavier_normal(key, shape):
    fan_out, fan_in = shape  # (num_rows, embedding_size)
    std = (2.0 / (fan_in + fan_out)) ** 0.5
    return std * jax.random.normal(key, shape, dtype=jnp.float32)


if __name__ == "__main__":
    # Small, deterministic setup consistent with the module's __init__.
    num_users, num_bundles, num_items = 32, 48, 64
    embedding_size = 32
    embed_l2_norm = 1e-4
    B, nb = 2, 8  # batch of users, bundles per user

    key = jax.random.PRNGKey(0)
    k_u, k_b, k_iu, k_ib = jax.random.split(key, 4)

    users_feature = xavier_normal(k_u, (num_users, embedding_size))
    bundles_feature = xavier_normal(k_b, (num_bundles, embedding_size))

    users = jax.random.randint(k_iu, (B, 1), 0, num_users, dtype=jnp.int32)
    bundles = jax.random.randint(k_ib, (B, nb), 0, num_bundles, dtype=jnp.int32)

    pred, loss = mf_forward(users_feature, bundles_feature, users, bundles, embed_l2_norm)
    jax.block_until_ready((pred, loss))

    # Reference check in plain JAX (mirrors the PyTorch forward exactly).
    b_emb = jnp.take(bundles_feature, bundles, axis=0)
    u_emb = jnp.broadcast_to(
        jnp.take(users_feature, users[:, 0], axis=0)[:, None, :], b_emb.shape)
    pred_ref = jnp.sum(u_emb * b_emb, axis=-1)
    loss_ref = embed_l2_norm * (jnp.sum(u_emb ** 2) + jnp.sum(b_emb ** 2))
    assert jnp.allclose(pred, pred_ref, atol=1e-5, rtol=1e-5)
    assert jnp.allclose(loss, loss_ref, atol=1e-5, rtol=1e-5)

    print("KERNEL_OK")
</pallas_src>

<mosaic_0001>
module attributes {stable_mosaic.version = 11 : i64} {
  func.func @_mf_forward_kernel(%arg0: i32, %arg1: memref<8x32xf32, #tpu.memory_space<vmem>>, %arg2: memref<8x256xf32, #tpu.memory_space<vmem>>, %arg3: memref<8x8xf32, #tpu.memory_space<vmem>>, %arg4: memref<1x1x128xf32, #tpu.memory_space<vmem>>) attributes {dimension_semantics = [#tpu.dimension_semantics<parallel>], iteration_bounds = array<i64: 1>, scalar_prefetch = 0 : i64, scratch_operands = 0 : i64, tpu.core_type = #tpu.core_type<tc>, window_params = [{transform_indices = @transform_0, window_bounds = array<i64: 8, 32>}, {transform_indices = @transform_1, window_bounds = array<i64: 8, 256>}, {transform_indices = @transform_2, window_bounds = array<i64: 8, 8>}, {transform_indices = @transform_3, window_bounds = array<i64: 1, 1, 128>}]} {
    %c0 = arith.constant 0 : index
    %c0_0 = arith.constant 0 : index
    %0 = vector.load %arg1[%c0, %c0_0] : memref<8x32xf32, #tpu.memory_space<vmem>>, vector<8x32xf32>
    %c8_i32 = arith.constant 8 : i32
    %1 = arith.muli %arg0, %c8_i32 : i32
    %2 = tpu.iota {dimensions = array<i32: 0>} : vector<8x1xi32>
    %3 = vector.broadcast %1 : i32 to vector<8x1xi32>
    %4 = arith.addi %3, %2 : vector<8x1xi32>
    %c2_i32 = arith.constant 2 : i32
    %5 = vector.broadcast %c2_i32 : i32 to vector<8x1xi32>
    %6 = arith.cmpi slt, %4, %5 : vector<8x1xi32>
    %7 = arith.extui %6 : vector<8x1xi1> to vector<8x1xi32>
    %8 = arith.sitofp %7 : vector<8x1xi32> to vector<8x1xf32>
    %9 = arith.mulf %0, %0 : vector<8x32xf32>
    %10 = vector.broadcast %8 : vector<8x1xf32> to vector<8x32xf32>
    %11 = arith.mulf %9, %10 : vector<8x32xf32>
    %12 = vector.shape_cast %11 : vector<8x32xf32> to vector<1x8x32xf32>
    %cst = arith.constant dense<0.000000e+00> : vector<1xf32>
    %13 = vector.multi_reduction <add>, %12, %cst [1, 2] : vector<1x8x32xf32> to vector<1xf32>
    %14 = vector.shape_cast %13 : vector<1xf32> to vector<1x1x1xf32>
    %15 = vector.extract %14[0, 0, 0] : f32 from vector<1x1x1xf32>
    %c0_1 = arith.constant 0 : index
    %c0_2 = arith.constant 0 : index
    %16 = vector.load %arg2[%c0_1, %c0_2] : memref<8x256xf32, #tpu.memory_space<vmem>>, vector<8x32xf32>
    %17 = arith.mulf %0, %16 : vector<8x32xf32>
    %cst_3 = arith.constant dense<0.000000e+00> : vector<8xf32>
    %18 = vector.multi_reduction <add>, %17, %cst_3 [1] : vector<8x32xf32> to vector<8xf32>
    %19 = vector.shape_cast %18 : vector<8xf32> to vector<8x1xf32>
    %20 = arith.mulf %16, %16 : vector<8x32xf32>
    %21 = vector.broadcast %8 : vector<8x1xf32> to vector<8x32xf32>
    %22 = arith.mulf %20, %21 : vector<8x32xf32>
    %23 = vector.shape_cast %22 : vector<8x32xf32> to vector<1x8x32xf32>
    %cst_4 = arith.constant dense<0.000000e+00> : vector<1xf32>
    %24 = vector.multi_reduction <add>, %23, %cst_4 [1, 2] : vector<1x8x32xf32> to vector<1xf32>
    %25 = vector.shape_cast %24 : vector<1xf32> to vector<1x1x1xf32>
    %26 = vector.extract %25[0, 0, 0] : f32 from vector<1x1x1xf32>
    %cst_5 = arith.constant 0.000000e+00 : f32
    %27 = arith.addf %cst_5, %26 : f32
    %c0_6 = arith.constant 0 : index
    %c32 = arith.constant 32 : index
    %28 = vector.load %arg2[%c0_6, %c32] : memref<8x256xf32, #tpu.memory_space<vmem>>, vector<8x32xf32>
    %29 = arith.mulf %0, %28 : vector<8x32xf32>
    %cst_7 = arith.constant dense<0.000000e+00> : vector<8xf32>
    %30 = vector.multi_reduction <add>, %29, %cst_7 [1] : vector<8x32xf32> to vector<8xf32>
    %31 = vector.shape_cast %30 : vector<8xf32> to vector<8x1xf32>
    %32 = arith.mulf %28, %28 : vector<8x32xf32>
    %33 = vector.broadcast %8 : vector<8x1xf32> to vector<8x32xf32>
    %34 = arith.mulf %32, %33 : vector<8x32xf32>
    %35 = vector.shape_cast %34 : vector<8x32xf32> to vector<1x8x32xf32>
    %cst_8 = arith.constant dense<0.000000e+00> : vector<1xf32>
    %36 = vector.multi_reduction <add>, %35, %cst_8 [1, 2] : vector<1x8x32xf32> to vector<1xf32>
    %37 = vector.shape_cast %36 : vector<1xf32> to vector<1x1x1xf32>
    %38 = vector.extract %37[0, 0, 0] : f32 from vector<1x1x1xf32>
    %39 = arith.addf %27, %38 : f32
    %c0_9 = arith.constant 0 : index
    %c64 = arith.constant 64 : index
    %40 = vector.load %arg2[%c0_9, %c64] : memref<8x256xf32, #tpu.memory_space<vmem>>, vector<8x32xf32>
    %41 = arith.mulf %0, %40 : vector<8x32xf32>
    %cst_10 = arith.constant dense<0.000000e+00> : vector<8xf32>
    %42 = vector.multi_reduction <add>, %41, %cst_10 [1] : vector<8x32xf32> to vector<8xf32>
    %43 = vector.shape_cast %42 : vector<8xf32> to vector<8x1xf32>
    %44 = arith.mulf %40, %40 : vector<8x32xf32>
    %45 = vector.broadcast %8 : vector<8x1xf32> to vector<8x32xf32>
    %46 = arith.mulf %44, %45 : vector<8x32xf32>
    %47 = vector.shape_cast %46 : vector<8x32xf32> to vector<1x8x32xf32>
    %cst_11 = arith.constant dense<0.000000e+00> : vector<1xf32>
    %48 = vector.multi_reduction <add>, %47, %cst_11 [1, 2] : vector<1x8x32xf32> to vector<1xf32>
    %49 = vector.shape_cast %48 : vector<1xf32> to vector<1x1x1xf32>
    %50 = vector.extract %49[0, 0, 0] : f32 from vector<1x1x1xf32>
    %51 = arith.addf %39, %50 : f32
    %c0_12 = arith.constant 0 : index
    %c96 = arith.constant 96 : index
    %52 = vector.load %arg2[%c0_12, %c96] : memref<8x256xf32, #tpu.memory_space<vmem>>, vector<8x32xf32>
    %53 = arith.mulf %0, %52 : vector<8x32xf32>
    %cst_13 = arith.constant dense<0.000000e+00> : vector<8xf32>
    %54 = vector.multi_reduction <add>, %53, %cst_13 [1] : vector<8x32xf32> to vector<8xf32>
    %55 = vector.shape_cast %54 : vector<8xf32> to vector<8x1xf32>
    %56 = arith.mulf %52, %52 : vector<8x32xf32>
    %57 = vector.broadcast %8 : vector<8x1xf32> to vector<8x32xf32>
    %58 = arith.mulf %56, %57 : vector<8x32xf32>
    %59 = vector.shape_cast %58 : vector<8x32xf32> to vector<1x8x32xf32>
    %cst_14 = arith.constant dense<0.000000e+00> : vector<1xf32>
    %60 = vector.multi_reduction <add>, %59, %cst_14 [1, 2] : vector<1x8x32xf32> to vector<1xf32>
    %61 = vector.shape_cast %60 : vector<1xf32> to vector<1x1x1xf32>
    %62 = vector.extract %61[0, 0, 0] : f32 from vector<1x1x1xf32>
    %63 = arith.addf %51, %62 : f32
    %c0_15 = arith.constant 0 : index
    %c128 = arith.constant 128 : index
    %64 = vector.load %arg2[%c0_15, %c128] : memref<8x256xf32, #tpu.memory_space<vmem>>, vector<8x32xf32>
    %65 = arith.mulf %0, %64 : vector<8x32xf32>
    %cst_16 = arith.constant dense<0.000000e+00> : vector<8xf32>
    %66 = vector.multi_reduction <add>, %65, %cst_16 [1] : vector<8x32xf32> to vector<8xf32>
    %67 = vector.shape_cast %66 : vector<8xf32> to vector<8x1xf32>
    %68 = arith.mulf %64, %64 : vector<8x32xf32>
    %69 = vector.broadcast %8 : vector<8x1xf32> to vector<8x32xf32>
    %70 = arith.mulf %68, %69 : vector<8x32xf32>
    %71 = vector.shape_cast %70 : vector<8x32xf32> to vector<1x8x32xf32>
    %cst_17 = arith.constant dense<0.000000e+00> : vector<1xf32>
    %72 = vector.multi_reduction <add>, %71, %cst_17 [1, 2] : vector<1x8x32xf32> to vector<1xf32>
    %73 = vector.shape_cast %72 : vector<1xf32> to vector<1x1x1xf32>
    %74 = vector.extract %73[0, 0, 0] : f32 from vector<1x1x1xf32>
    %75 = arith.addf %63, %74 : f32
    %c0_18 = arith.constant 0 : index
    %c160 = arith.constant 160 : index
    %76 = vector.load %arg2[%c0_18, %c160] : memref<8x256xf32, #tpu.memory_space<vmem>>, vector<8x32xf32>
    %77 = arith.mulf %0, %76 : vector<8x32xf32>
    %cst_19 = arith.constant dense<0.000000e+00> : vector<8xf32>
    %78 = vector.multi_reduction <add>, %77, %cst_19 [1] : vector<8x32xf32> to vector<8xf32>
    %79 = vector.shape_cast %78 : vector<8xf32> to vector<8x1xf32>
    %80 = arith.mulf %76, %76 : vector<8x32xf32>
    %81 = vector.broadcast %8 : vector<8x1xf32> to vector<8x32xf32>
    %82 = arith.mulf %80, %81 : vector<8x32xf32>
    %83 = vector.shape_cast %82 : vector<8x32xf32> to vector<1x8x32xf32>
    %cst_20 = arith.constant dense<0.000000e+00> : vector<1xf32>
    %84 = vector.multi_reduction <add>, %83, %cst_20 [1, 2] : vector<1x8x32xf32> to vector<1xf32>
    %85 = vector.shape_cast %84 : vector<1xf32> to vector<1x1x1xf32>
    %86 = vector.extract %85[0, 0, 0] : f32 from vector<1x1x1xf32>
    %87 = arith.addf %75, %86 : f32
    %c0_21 = arith.constant 0 : index
    %c192 = arith.constant 192 : index
    %88 = vector.load %arg2[%c0_21, %c192] : memref<8x256xf32, #tpu.memory_space<vmem>>, vector<8x32xf32>
    %89 = arith.mulf %0, %88 : vector<8x32xf32>
    %cst_22 = arith.constant dense<0.000000e+00> : vector<8xf32>
    %90 = vector.multi_reduction <add>, %89, %cst_22 [1] : vector<8x32xf32> to vector<8xf32>
    %91 = vector.shape_cast %90 : vector<8xf32> to vector<8x1xf32>
    %92 = arith.mulf %88, %88 : vector<8x32xf32>
    %93 = vector.broadcast %8 : vector<8x1xf32> to vector<8x32xf32>
    %94 = arith.mulf %92, %93 : vector<8x32xf32>
    %95 = vector.shape_cast %94 : vector<8x32xf32> to vector<1x8x32xf32>
    %cst_23 = arith.constant dense<0.000000e+00> : vector<1xf32>
    %96 = vector.multi_reduction <add>, %95, %cst_23 [1, 2] : vector<1x8x32xf32> to vector<1xf32>
    %97 = vector.shape_cast %96 : vector<1xf32> to vector<1x1x1xf32>
    %98 = vector.extract %97[0, 0, 0] : f32 from vector<1x1x1xf32>
    %99 = arith.addf %87, %98 : f32
    %c0_24 = arith.constant 0 : index
    %c224 = arith.constant 224 : index
    %100 = vector.load %arg2[%c0_24, %c224] : memref<8x256xf32, #tpu.memory_space<vmem>>, vector<8x32xf32>
    %101 = arith.mulf %0, %100 : vector<8x32xf32>
    %cst_25 = arith.constant dense<0.000000e+00> : vector<8xf32>
    %102 = vector.multi_reduction <add>, %101, %cst_25 [1] : vector<8x32xf32> to vector<8xf32>
    %103 = vector.shape_cast %102 : vector<8xf32> to vector<8x1xf32>
    %104 = arith.mulf %100, %100 : vector<8x32xf32>
    %105 = vector.broadcast %8 : vector<8x1xf32> to vector<8x32xf32>
    %106 = arith.mulf %104, %105 : vector<8x32xf32>
    %107 = vector.shape_cast %106 : vector<8x32xf32> to vector<1x8x32xf32>
    %cst_26 = arith.constant dense<0.000000e+00> : vector<1xf32>
    %108 = vector.multi_reduction <add>, %107, %cst_26 [1, 2] : vector<1x8x32xf32> to vector<1xf32>
    %109 = vector.shape_cast %108 : vector<1xf32> to vector<1x1x1xf32>
    %110 = vector.extract %109[0, 0, 0] : f32 from vector<1x1x1xf32>
    %111 = arith.addf %99, %110 : f32
    %112 = tpu.concatenate %19, %31, %43, %55, %67, %79, %91, %103 in 1 : vector<8x1xf32>, vector<8x1xf32>, vector<8x1xf32>, vector<8x1xf32>, vector<8x1xf32>, vector<8x1xf32>, vector<8x1xf32>, vector<8x1xf32> -> vector<8x8xf32>
    %c0_27 = arith.constant 0 : index
    %c0_28 = arith.constant 0 : index
    %113 = vector.load %arg3[%c0_27, %c0_28] : memref<8x8xf32, #tpu.memory_space<vmem>>, vector<8x8xf32>
    tpu.vector_store %arg3[%c0_27, %c0_28], %112 {strides = array<i32>} : memref<8x8xf32, #tpu.memory_space<vmem>>, vector<8x8xf32>,
    %cst_29 = arith.constant 8.000000e+00 : f32
    %114 = arith.mulf %cst_29, %15 : f32
    %115 = arith.addf %114, %111 : f32
    %cst_30 = arith.constant 9.99999974E-5 : f32
    %116 = arith.mulf %cst_30, %115 : f32
    %117 = vector.broadcast %116 : f32 to vector<1x1x128xf32>
    %c0_31 = arith.constant 0 : index
    %c0_32 = arith.constant 0 : index
    %c0_33 = arith.constant 0 : index
    %118 = vector.load %arg4[%c0_31, %c0_32, %c0_33] : memref<1x1x128xf32, #tpu.memory_space<vmem>>, vector<1x1x128xf32>
    tpu.vector_store %arg4[%c0_31, %c0_32, %c0_33], %117 {strides = array<i32>} : memref<1x1x128xf32, #tpu.memory_space<vmem>>, vector<1x1x128xf32>,
    return
  }
  func.func @transform_0(%arg0: i32) -> (i32, i32) {
    %c0_i32 = arith.constant 0 : i32
    %c0_i32_0 = arith.constant 0 : i32
    return %arg0, %c0_i32 : i32, i32
  }
  func.func @transform_1(%arg0: i32) -> (i32, i32) {
    %c0_i32 = arith.constant 0 : i32
    %c0_i32_0 = arith.constant 0 : i32
    return %arg0, %c0_i32 : i32, i32
  }
  func.func @transform_2(%arg0: i32) -> (i32, i32) {
    %c0_i32 = arith.constant 0 : i32
    %c0_i32_0 = arith.constant 0 : i32
    return %arg0, %c0_i32 : i32, i32
  }
  func.func @transform_3(%arg0: i32) -> (i32, i32, i32) {
    %c0_i32 = arith.constant 0 : i32
    %c0_i32_0 = arith.constant 0 : i32
    %c0_i32_1 = arith.constant 0 : i32
    return %arg0, %c0_i32, %c0_i32_0 : i32, i32, i32
  }
}

</mosaic_0001>

<bundles_post_ra>
// kernel: tpu_custom_call.1
= control target key start
LH: loop header
LB: loop body
LE: loop exit
PB: predicated region body
PF: predicated region fallthrough
CT: control target
= control target key end

     0   :  { %9 = vsyncpa [#allocation3], 0  ;;  %s509_s0 = inlined_call_operand.hbm [shape: f32[8,32], index: 0, kind: input, shape index: {}]   ;;  %s510_s1 = inlined_call_operand.hbm [shape: f32[8,256], index: 1, kind: input, shape index: {}]   ;;  %s511_s2 = inlined_call_operand.hbm [shape: f32[8,8], index: 2, kind: output, shape index: {0}]   ;;  %s512_s3 = inlined_call_operand.hbm [shape: f32[1,1,128], index: 3, kind: output, shape index: {1}]  }
   0x1   :  { %10 = vsyncpa [#allocation6], 0 }
   0x2   :  { %11 = vsyncpa [#allocation4], 0 }
   0x3   :  { %12 = vsyncpa [#allocation9], 0  ;;  %s18_s14 = sshll.u32 %s509_s0, 4  ;;  %s417_s15 = smov [#allocation2]   ;;  %s19_s14 = int_to_ptr.hbm [resolvable:$true] %s18_s14 }
   0x4   :  { %s20_s16 = sshll.u32 %s417_s15, 4  ;;  %s29_s19 = sshll.u32 %s510_s1, 4  ;;  %s21_s16 = int_to_ptr.vmem [resolvable:$true] %s20_s16  ;;  %s30_s19 = int_to_ptr.hbm [resolvable:$true] %s29_s19 }
   0x5   :  { %23 = dma.hbm_to_vmem [thread:$0]  %s19_s14, 128, %s21_s16, [#allocation3]  }
   0x6   :  { %s418_s20 = smov [#allocation5]  }
   0x7   :  { %s31_s21 = sshll.u32 %s418_s20, 4  ;;  %s32_s21 = int_to_ptr.vmem [resolvable:$true] %s31_s21 }
   0x8   :  { %34 = dma.hbm_to_vmem [thread:$0]  %s30_s19, 256, %s32_s21, [#allocation6]  }
   0x9   :  { %409 = dma.done.wait [#allocation3], 128  }
   0xa   :  { %410 = vsyncadd [#allocation3], 4294967168 }
   0xb   :  { %411 = dma.done.wait [#allocation6], 256  }
   0xc   :  { %412 = vsyncadd [#allocation6], 4294967040  ;;  %v45_v0 = vlaneseq  ;;  %v451_v2 = vld [vmem:[#allocation2] sm:$0xff]  ;;  %vm54_vm1 = vcmask 261120   ;;  %v65_v3 = vld [vmem:[#allocation5] sm:$0xff]  ;;  %v419_v4 = vmov 0.0  }
   0xd   :  { %v66_v6 = vmul.f32 %v65_v3, %v451_v2  ;;  %v70_v7 = vmul.f32 %v65_v3, %v65_v3  ;;  %v52_v8 = vmul.f32 %v451_v2, %v451_v2  ;;  %s420_s0 = smov 96   ;;  %v460_v14 = vld [vmem:[#allocation5 + $0x8] sm:$0xff]  ;;  %s421_s1 = smov 32   ;;  %vm231_vm2 = vcmask 7168  }
   0xe   :  { %v46_v1 = vshrl.u32 %v45_v0, 7  ;;  %v153_v15 = vmul.f32 %v460_v14, %v460_v14  ;;  %s422_s22 = smov 64   ;;  %v149_v43 = vmul.f32 %v460_v14, %v451_v2  ;;  %vm233_vm3 = vcmask 15360   ;;  %s423_s13 = smov [#allocation8]  }
   0xf   :  { %v67_v9 = vsel %vm54_vm1, %v66_v6, 0.0  ;;  %vm235_vm4 = vcmask 23552   ;;  %vm237_vm5 = vcmask 31744   ;;  %s268_s14 = sshll.u32 %s423_s13, 4  ;;  %s270_s18 = sshll.u32 %s512_s3, 4  ;;  %vm239_vm6 = vcmask 39936   ;;  %s269_s14 = int_to_ptr.vmem [resolvable:$true] %s268_s14  ;;  %s271_s18 = int_to_ptr.hbm [resolvable:$true] %s270_s18 }
  0x10   :  { %vm49_vm0 = vcmp.lt.s32.totalorder %v46_v1, 2  ;;  %68 = vadd.xlane.f32.xlu0 %v67_v9  ;;  %v150_v46 = vsel %vm54_vm1, %v149_v43, 0.0  ;;  %vm241_vm7 = vcmask 48128   ;;  %s424_s20 = smov [#allocation7]   ;;  %vm243_vm8 = vcmask 56320  }
  0x11   :  { %v286_v5 = vsel %vm49_vm0, 1.0, %v419_v4  ;;  %s257_s21 = sshll.u32 %s424_s20, 4  ;;  %vm245_vm9 = vcmask 64512   ;;  %s258_s21 = int_to_ptr.vmem [resolvable:$true] %s257_s21 }
  0x12   :  { %v71_v10 = vmul.f32 %v286_v5, %v70_v7  ;;  %v53_v12 = vmul.f32 %v286_v5, %v52_v8  ;;  %v154_v16 = vmul.f32 %v286_v5, %v153_v15 }
  0x14   :  { %v72_v11 = vsel %vm54_vm1, %v71_v10, 0.0  ;;  %92 = vrot.lane.b32.xlu2 %v71_v10, %s420_s0  ;;  %v55_v13 = vsel %vm54_vm1, %v53_v12, 0.0  ;;  %v155_v51 = vsel %vm54_vm1, %v154_v16, 0.0 }
  0x15   :  { %73 = vadd.xlane.f32.xlu1 %v72_v11 }
  0x18   :  { %56 = vadd.xlane.f32.xlu0 %v55_v13 }
  0x1c   :  { %134 = vrot.lane.b32.xlu2 %v71_v10, %s421_s1 }
  0x24   :  { %217 = vrot.lane.b32.xlu2 %v154_v16, %s421_s1 }
  0x2c   :  { %106 = vrot.lane.b32.xlu0 %v65_v3, %s422_s22 }
  0x2e   :  { %84 = vrot.lane.b32.xlu1 %v65_v3, %s420_s0 }
  0x34   :  { %127 = vrot.lane.b32.xlu0 %v65_v3, %s421_s1 }
  0x36   :  { %113 = vrot.lane.b32.xlu1 %v71_v10, %s422_s22 }
  0x3c   :  { %196 = vrot.lane.b32.xlu0 %v154_v16, %s422_s22 }
  0x3e   :  { %175 = vrot.lane.b32.xlu1 %v154_v16, %s420_s0 }
  0x6e   :  { %v93_v36 = vpop.permute.xlu2 %92 }
  0x6f   :  { %v95_v48 = vsel %vm54_vm1, %v93_v36, 0.0 }
  0x76   :  { %v135_v45 = vpop.permute.xlu2 %134 }
  0x77   :  { %v137_v47 = vsel %vm54_vm1, %v135_v45, 0.0 }
  0x7e   :  { %v218_v52 = vpop.permute.xlu2 %217 }
  0x7f   :  { %v220_v53 = vsel %vm54_vm1, %v218_v52, 0.0 }
  0x83   :  { %v69_v17 = vpop.xlane.xlu0 %68 }
  0x88   :  { %v74_v18 = vpop.xlane.xlu1 %73 }
  0x89   :  { %v75_v19 = vrot.slane %v74_v18, 4 }
  0x8b   :  { %v76_v20 = vadd.f32 %v75_v19, %v74_v18  ;;  %v57_v22 = vpop.xlane.xlu0 %56 }
  0x8c   :  { %v58_v23 = vrot.slane %v57_v22, 4 }
  0x8d   :  { %v77_v21 = vrot.slane %v76_v20, 2 }
  0x8e   :  { %v59_v24 = vadd.f32 %v58_v23, %v57_v22 }
  0x8f   :  { %v78_v25 = vadd.f32 %v77_v21, %v76_v20 }
  0x90   :  { %v60_v26 = vrot.slane %v59_v24, 2 }
  0x91   :  { %v79_v28 = vrot.slane %v78_v25, 1 }
  0x92   :  { %v61_v27 = vadd.f32 %v60_v26, %v59_v24 }
  0x93   :  { %v80_v31 = vadd.f32 %v79_v28, %v78_v25 }
  0x94   :  { %v62_v29 = vrot.slane %v61_v27, 1 }
  0x96   :  { %v63_v30 = vadd.f32 %v62_v29, %v61_v27 }
  0x98   :  { %287 = vpush %v63_v30 }
  0x99   :  { %289 = vpush %v80_v31 }
  0x9e   :  { %v107_v34 = vpop.permute.xlu0 %106 }
  0x9f   :  { %v109_v37 = vmul.f32 %v107_v34, %v451_v2 }
  0xa0   :  { %v85_v32 = vpop.permute.xlu1 %84 }
  0xa1   :  { %v87_v33 = vmul.f32 %v85_v32, %v451_v2  ;;  %v110_v41 = vsel %vm54_vm1, %v109_v37, 0.0 }
  0xa3   :  { %v88_v35 = vsel %vm54_vm1, %v87_v33, 0.0 }
  0xa4   :  { %89 = vadd.xlane.f32.xlu2 %v88_v35 }
  0xa6   :  { %v128_v39 = vpop.permute.xlu0 %127 }
  0xa7   :  { %v130_v42 = vmul.f32 %v128_v39, %v451_v2 }
  0xa8   :  { %v114_v38 = vpop.permute.xlu1 %113 }
  0xa9   :  { %v116_v40 = vsel %vm54_vm1, %v114_v38, 0.0  ;;  %v131_v44 = vsel %vm54_vm1, %v130_v42, 0.0 }
  0xaa   :  { %117 = vadd.xlane.f32.xlu1 %v116_v40  ;;  %132 = vadd.xlane.f32.xlu0 %v131_v44 }
  0xac   :  { %111 = vadd.xlane.f32.xlu2 %v110_v41 }
  0xae   :  { %v197_v54 = vpop.permute.xlu0 %196 }
  0xaf   :  { %v199_v55 = vsel %vm54_vm1, %v197_v54, 0.0 }
  0xb0   :  { %v176_v49 = vpop.permute.xlu1 %175 }
  0xb1   :  { %v178_v50 = vsel %vm54_vm1, %v176_v49, 0.0 }
  0xb2   :  { %151 = vadd.xlane.f32.xlu1 %v150_v46  ;;  %96 = vadd.xlane.f32.xlu0 %v95_v48 }
  0xb4   :  { %138 = vadd.xlane.f32.xlu2 %v137_v47 }
  0xba   :  { %179 = vadd.xlane.f32.xlu1 %v178_v50  ;;  %156 = vadd.xlane.f32.xlu0 %v155_v51 }
  0xc2   :  { %221 = vadd.xlane.f32.xlu1 %v220_v53  ;;  %200 = vadd.xlane.f32.xlu0 %v199_v55 }
  0xc9   :  { %s288_s23 = spop %287 }
  0xca   :  { %s290_s24 = spop %289  ;;  %s247_s11 = smul.f32 8.0, %s288_s23 }
  0xcc   :  { %167 = vrot.lane.b32.xlu2 %v460_v14, %s420_s0 }
  0xd4   :  { %210 = vrot.lane.b32.xlu2 %v460_v14, %s421_s1 }
  0xdb   :  { %189 = vrot.lane.b32.xlu1 %v460_v14, %s422_s22  ;;  %s259_s22 = sshll.u32 %s511_s2, 4  ;;  %s260_s22 = int_to_ptr.hbm [resolvable:$true] %s259_s22 }
 0x117   :  { %v90_v56 = vpop.xlane.xlu2 %89 }
 0x118   :  { %v232_v58 = vsel %vm231_vm2, %v69_v17, %v90_v56 }
 0x11d   :  { %v118_v57 = vpop.xlane.xlu1 %117  ;;  %v133_v62 = vpop.xlane.xlu0 %132 }
 0x11e   :  { %v119_v60 = vrot.slane %v118_v57, 4 }
 0x11f   :  { %v112_v59 = vpop.xlane.xlu2 %111 }
 0x120   :  { %v234_v61 = vsel %vm233_vm3, %v232_v58, %v112_v59  ;;  %v120_v0 = vadd.f32 %v119_v60, %v118_v57 }
 0x121   :  { %v236_v63 = vsel %vm235_vm4, %v234_v61, %v133_v62 }
 0x122   :  { %v121_v5 = vrot.slane %v120_v0, 2 }
 0x124   :  { %v122_v12 = vadd.f32 %v121_v5, %v120_v0 }
 0x125   :  { %v152_v1 = vpop.xlane.xlu1 %151  ;;  %v97_v7 = vpop.xlane.xlu0 %96 }
 0x126   :  { %v494_v3 = vsel %vm237_vm5, %v236_v63, %v152_v1  ;;  %v98_v8 = vrot.slane %v97_v7, 4  ;;  %v123_v22 = vrot.slane %v122_v12, 1 }
 0x127   :  { %v139_v4 = vpop.xlane.xlu2 %138 }
 0x128   :  { %v140_v6 = vrot.slane %v139_v4, 4  ;;  %v99_v10 = vadd.f32 %v98_v8, %v97_v7  ;;  %v124_v31 = vadd.f32 %v123_v22, %v122_v12 }
 0x12a   :  { %v141_v9 = vadd.f32 %v140_v6, %v139_v4  ;;  %v100_v13 = vrot.slane %v99_v10, 2 }
 0x12c   :  { %v142_v11 = vrot.slane %v141_v9, 2  ;;  %v101_v18 = vadd.f32 %v100_v13, %v99_v10 }
 0x12d   :  { %v180_v14 = vpop.xlane.xlu1 %179  ;;  %v157_v21 = vpop.xlane.xlu0 %156 }
 0x12e   :  { %v181_v15 = vrot.slane %v180_v14, 4  ;;  %v143_v16 = vadd.f32 %v142_v11, %v141_v9  ;;  %v158_v24 = vrot.slane %v157_v21, 4  ;;  %v102_v25 = vrot.slane %v101_v18, 1 }
 0x12f   :  { %v168_v17 = vpop.permute.xlu2 %167 }
 0x130   :  { %v182_v19 = vadd.f32 %v181_v15, %v180_v14  ;;  %v170_v20 = vmul.f32 %v168_v17, %v451_v2  ;;  %v144_v23 = vrot.slane %v143_v16, 1  ;;  %v159_v28 = vadd.f32 %v158_v24, %v157_v21 }
 0x131   :  { %v103_v29 = vadd.f32 %v102_v25, %v101_v18 }
 0x132   :  { %v183_v26 = vrot.slane %v182_v19, 2  ;;  %v171_v27 = vsel %vm54_vm1, %v170_v20, 0.0  ;;  %v145_v30 = vadd.f32 %v144_v23, %v143_v16  ;;  %v160_v33 = vrot.slane %v159_v28, 2 }
 0x133   :  { %172 = vadd.xlane.f32.xlu0 %v171_v27  ;;  %291 = vpush %v103_v29 }
 0x134   :  { %v184_v32 = vadd.f32 %v183_v26, %v182_v19  ;;  %293 = vpush %v124_v31  ;;  %v161_v36 = vadd.f32 %v160_v33, %v159_v28 }
 0x135   :  { %v222_v34 = vpop.xlane.xlu1 %221  ;;  %295 = vpush %v145_v30  ;;  %v201_v39 = vpop.xlane.xlu0 %200 }
 0x136   :  { %v223_v35 = vrot.slane %v222_v34, 4  ;;  %v185_v40 = vrot.slane %v184_v32, 1  ;;  %v202_v42 = vrot.slane %v201_v39, 4  ;;  %v162_v43 = vrot.slane %v161_v36, 1 }
 0x137   :  { %v211_v37 = vpop.permute.xlu2 %210 }
 0x138   :  { %v224_v38 = vadd.f32 %v223_v35, %v222_v34  ;;  %v213_v41 = vmul.f32 %v211_v37, %v451_v2  ;;  %v203_v46 = vadd.f32 %v202_v42, %v201_v39  ;;  %v163_v47 = vadd.f32 %v162_v43, %v161_v36 }
 0x139   :  { %v186_v48 = vadd.f32 %v185_v40, %v184_v32 }
 0x13a   :  { %v225_v44 = vrot.slane %v224_v38, 2  ;;  %v214_v45 = vsel %vm54_vm1, %v213_v41, 0.0  ;;  %v204_v50 = vrot.slane %v203_v46, 2  ;;  %297 = vpush %v163_v47 }
 0x13b   :  { %215 = vadd.xlane.f32.xlu2 %v214_v45  ;;  %299 = vpush %v186_v48 }
 0x13c   :  { %v226_v49 = vadd.f32 %v225_v44, %v224_v38  ;;  %v205_v51 = vadd.f32 %v204_v50, %v203_v46 }
 0x13e   :  { %v227_v52 = vrot.slane %v226_v49, 1  ;;  %v206_v53 = vrot.slane %v205_v51, 1 }
 0x140   :  { %v207_v54 = vadd.f32 %v206_v53, %v205_v51  ;;  %v228_v55 = vadd.f32 %v227_v52, %v226_v49 }
 0x142   :  { %301 = vpush %v207_v54 }
 0x143   :  { %303 = vpush %v228_v55 }
 0x14d   :  { %v190_v56 = vpop.permute.xlu1 %189 }
 0x14e   :  { %v192_v57 = vmul.f32 %v190_v56, %v451_v2 }
 0x150   :  { %v193_v58 = vsel %vm54_vm1, %v192_v57, 0.0 }
 0x151   :  { %194 = vadd.xlane.f32.xlu0 %v193_v58 }
 0x164   :  { %s292_s25 = spop %291 }
 0x165   :  { %s105_s26 = sadd.f32 %s292_s25, %s290_s24  ;;  %s294_s27 = spop %293 }
 0x166   :  { %s296_s29 = spop %295 }
 0x167   :  { %s126_s28 = sadd.f32 %s294_s27, %s105_s26 }
 0x169   :  { %s147_s4 = sadd.f32 %s296_s29, %s126_s28 }
 0x16b   :  { %s298_s30 = spop %297 }
 0x16c   :  { %s165_s5 = sadd.f32 %s298_s30, %s147_s4  ;;  %s300_s6 = spop %299 }
 0x16e   :  { %s188_s7 = sadd.f32 %s300_s6, %s165_s5 }
 0x173   :  { %s302_s8 = spop %301 }
 0x174   :  { %s209_s9 = sadd.f32 %s302_s8, %s188_s7  ;;  %s304_s10 = spop %303 }
 0x176   :  { %s230_s12 = sadd.f32 %s304_s10, %s209_s9 }
 0x178   :  { %s248_s15 = sadd.f32 %s247_s11, %s230_s12 }
 0x17a   :  { %s249_s19 = smul.f32 0.0001, %s248_s15 }
 0x17c   :  { %v250_v2 = vstv %s249_s19 }
 0x17d   :  { %251 = vst [vmem:[#allocation8] sm:$0x1] %v250_v2 }
 0x17e   :  { %273 = dma.vmem_to_hbm [thread:$0]  %s269_s14, 16, %s271_s18, [#allocation9]  }
 0x1a6   :  { %v173_v59 = vpop.xlane.xlu0 %172 }
 0x1a7   :  { %v240_v61 = vsel %vm239_vm6, %v494_v3, %v173_v59 }
 0x1ae   :  { %v216_v60 = vpop.xlane.xlu2 %215 }
 0x1c4   :  { %v195_v62 = vpop.xlane.xlu0 %194 }
 0x1c5   :  { %v242_v63 = vsel %vm241_vm7, %v240_v61, %v195_v62 }
 0x1c6   :  { %v244_v0 = vsel %vm243_vm8, %v242_v63, %v216_v60 }
 0x1c7   :  { %246 = vst.msk [vmem:[#allocation7] sm:$0xff] %vm245_vm9, %v244_v0 }
 0x1c8   :  { %262 = dma.vmem_to_hbm [thread:$0]  %s258_s21, 128, %s260_s22, [#allocation4]  }
 0x1c9   :  { %413 = dma.done.wait [#allocation4], 128  }
 0x1ca   :  { %414 = vsyncadd [#allocation4], 4294967168 }
 0x1cb   :  { %415 = dma.done.wait [#allocation9], 16  }
 0x1cc   :  { %416 = vsyncadd [#allocation9], 4294967280 }
 0x1cd   :  { %282 = vsyncpa [#allocation3], 1 }
 0x1ce   :  { %283 = vsyncpa [#allocation6], 1 }
 0x1cf   :  { %284 = vsyncpa [#allocation4], 1 }
 0x1d0   :  { %285 = vsyncpa [#allocation9], 1 }

</bundles_post_ra>
